<compile_context>
chip_gen: v7x
topology: tpu7x:2x2x1
jax: 0.10.0
libtpu: 0.0.40
codegen_flags: <defaults>
</compile_context>

<pallas_src>
import math
import jax
import jax.numpy as jnp
from jax import lax
from jax.experimental import pallas as pl
from jax.experimental.pallas import tpu as pltpu


# ------------------------------- small helpers --------------------------------
def _round_up(x, m):
    return ((x + m - 1) // m) * m


def _pick_tile(dim, want, align):
    """Largest tile <= want that divides dim and is a multiple of align; else full dim."""
    if dim <= want:
        return dim
    t = (want // align) * align
    while t >= align:
        if dim % t == 0:
            return t
        t -= align
    return dim


def _pick_time_block(T, want=32):
    for t in range(min(T, want), 0, -1):
        if T % t == 0:
            return t
    return 1


# --------------------------- tiled matmul + bias kernel ------------------------
def _matmul_bias_kernel(x_ref, w_ref, b_ref, o_ref):
    # bf16 MXU operands, f32 accumulation, bias added in f32.
    acc = jnp.dot(x_ref[...].astype(jnp.bfloat16), w_ref[...],
                  preferred_element_type=jnp.float32)
    o_ref[...] = (acc + b_ref[...]).astype(o_ref.dtype)


def matmul_bias(x, w_t, b, *, out_dtype=None, tm_want=256, tn_want=512):
    """x: [N, K]; w_t: [K, V] (bf16); b: [1, V] (f32) -> [N, V] in out_dtype."""
    N, K = x.shape
    V = w_t.shape[-1]
    out_dtype = out_dtype or x.dtype
    tm = _pick_tile(N, tm_want, 8)
    tn = _pick_tile(V, tn_want, 128)
    # TODO(synk): generation-gate (tm, tn) and set vmem_limit_bytes explicitly at
    # realistic Hp / vocab sizes (512/1024 tiles on v6e; smaller on v7x's 64 MiB VMEM).
    return pl.pallas_call(
        _matmul_bias_kernel,
        out_shape=jax.ShapeDtypeStruct((N, V), out_dtype),
        grid=(N // tm, V // tn),
        in_specs=[
            pl.BlockSpec((tm, K), lambda i, j: (i, 0)),
            pl.BlockSpec((K, tn), lambda i, j: (0, j)),
            pl.BlockSpec((1, tn), lambda i, j: (0, j)),
        ],
        out_specs=pl.BlockSpec((tm, tn), lambda i, j: (i, j)),
        compiler_params=pltpu.CompilerParams(
            dimension_semantics=("parallel", "parallel")),
    )(x, w_t, b)


# ---------------------------- LSTM recurrence kernel ---------------------------
def _lstm_rec_kernel(xg_ref, h0_ref, c0_ref, whh_ref,
                     y_ref, hT_ref, cT_ref, h_scr, c_scr):
    tb = pl.program_id(0)
    Hp = h_scr.shape[-1]
    t_blk = xg_ref.shape[0]

    @pl.when(tb == 0)
    def _():
        h_scr[...] = h0_ref[...].astype(jnp.float32)
        c_scr[...] = c0_ref[...].astype(jnp.float32)

    def step(t, carry):
        h, c = carry
        # W_hh stays a Ref read at the point of use (never a long-lived vreg value);
        # Mosaic is expected to hoist the MXU weight push out of the unrolled loop.
        # TODO(synk): if bundle dumps show a per-step weight push, switch to explicit
        # pltpu.matmul_push_rhs / matmul_acc_lhs / matmul_pop driving per time block.
        gates = xg_ref[t].astype(jnp.float32) + jnp.dot(
            h.astype(jnp.bfloat16), whh_ref[...],
            preferred_element_type=jnp.float32)            # [B, 4Hp] f32

        sig_if = jax.nn.sigmoid(gates[:, 0:2 * Hp])        # fused i|f EUP push
        i_g = sig_if[:, :Hp]
        f_g = sig_if[:, Hp:]
        g_g = jnp.tanh(gates[:, 2 * Hp:3 * Hp])
        o_g = jax.nn.sigmoid(gates[:, 3 * Hp:4 * Hp])

        c_new = f_g * c + i_g * g_g
        h_new = o_g * jnp.tanh(c_new)
        y_ref[t] = h_new.astype(y_ref.dtype)               # lane-dense per-step store
        return (h_new, c_new)

    # h/c carried in vregs across the block (B*Hp f32 is tiny here), written back to
    # VMEM scratch only once per time block -> ~3x less per-step vst traffic on v5e.
    h_fin, c_fin = lax.fori_loop(0, t_blk, step,
                                 (h_scr[...], c_scr[...]), unroll=True)
    h_scr[...] = h_fin
    c_scr[...] = c_fin

    # Final states written once, on the last grid step only.
    @pl.when(tb == pl.num_programs(0) - 1)
    def _():
        hT_ref[...] = h_fin.astype(hT_ref.dtype)
        cT_ref[...] = c_fin.astype(cT_ref.dtype)


def lstm_recurrence(xg, h0, c0, w_hh_t, *, t_blk_want=32):
    """xg: [T, B, 4Hp] bf16 precomputed input gates; h0/c0: [B, Hp] f32; w_hh_t: [Hp, 4Hp] bf16."""
    T, B, G = xg.shape
    Hp = G // 4
    t_blk = _pick_time_block(T, t_blk_want)

    out_shapes = (
        jax.ShapeDtypeStruct((T, B, Hp), jnp.bfloat16),   # full hidden sequence
        jax.ShapeDtypeStruct((B, Hp), jnp.float32),       # h_T
        jax.ShapeDtypeStruct((B, Hp), jnp.float32),       # c_T
    )
    return pl.pallas_call(
        _lstm_rec_kernel,
        out_shape=out_shapes,
        grid=(T // t_blk,),
        in_specs=[
            pl.BlockSpec((t_blk, B, G), lambda tb: (tb, 0, 0)),
            pl.BlockSpec((B, Hp), lambda tb: (0, 0)),
            pl.BlockSpec((B, Hp), lambda tb: (0, 0)),
            # TODO(synk): pipeline_mode=pl.Buffered(1) on this loop-invariant weight
            # would halve its VMEM residency at large Hp (matters on v7x's 64 MiB VMEM).
            pl.BlockSpec((Hp, G), lambda tb: (0, 0)),
        ],
        out_specs=(
            pl.BlockSpec((t_blk, B, Hp), lambda tb: (tb, 0, 0)),
            pl.BlockSpec((B, Hp), lambda tb: (0, 0)),
            pl.BlockSpec((B, Hp), lambda tb: (0, 0)),
        ),
        scratch_shapes=[
            pltpu.VMEM((B, Hp), jnp.float32),
            pltpu.VMEM((B, Hp), jnp.float32),
        ],
        # Time axis is a true recurrence -> "arbitrary".
        # TODO(synk): at realistic batch add a leading "parallel" batch-tile grid axis
        # so v7x's second TensorCore shares the recurrence; pointless at B=2.
        compiler_params=pltpu.CompilerParams(
            dimension_semantics=("arbitrary",)),
    )(xg, h0, c0, w_hh_t)


# --------------------------------- parameters ----------------------------------
def _pad_gates_cols(w_t, H, Hp):
    """[in, 4H] -> [in, 4Hp]: gate k occupies cols [k*Hp, k*Hp+H), zeros elsewhere."""
    in_dim = w_t.shape[0]
    w4 = w_t.reshape(in_dim, 4, H)
    return jnp.pad(w4, ((0, 0), (0, 0), (0, Hp - H))).reshape(in_dim, 4 * Hp)


def init_params(key, vocab_size, embedding_dim, hidden_dim, num_layers):
    """Deterministic init mirroring the PyTorch module; weights packed lane-aligned, bf16."""
    Hp = _round_up(hidden_dim, 128)
    Vp = _round_up(vocab_size, 128)
    params = {"hidden_dim": hidden_dim, "hidden_dim_padded": Hp,
              "vocab_size": vocab_size, "vocab_padded": Vp}

    k_emb, k_fc, key = jax.random.split(key, 3)
    init_range = 0.1
    params["embedding"] = jax.random.uniform(
        k_emb, (vocab_size, embedding_dim), jnp.float32, -init_range, init_range)

    # nn.LSTM default init: U(-1/sqrt(H), 1/sqrt(H)) for all weights & biases.
    stdv = 1.0 / math.sqrt(hidden_dim)
    layers = []
    for layer in range(num_layers):
        in_dim = embedding_dim if layer == 0 else hidden_dim
        key, k1, k2, k3, k4 = jax.random.split(key, 5)
        w_ih = jax.random.uniform(k1, (4 * hidden_dim, in_dim), jnp.float32, -stdv, stdv)
        w_hh = jax.random.uniform(k2, (4 * hidden_dim, hidden_dim), jnp.float32, -stdv, stdv)
        b_ih = jax.random.uniform(k3, (4 * hidden_dim,), jnp.float32, -stdv, stdv)
        b_hh = jax.random.uniform(k4, (4 * hidden_dim,), jnp.float32, -stdv, stdv)

        # Packed, Hp-padded kernel layouts; MXU operands stored bf16.
        w_ih_t = _pad_gates_cols(w_ih.T, hidden_dim, Hp)              # [in_dim, 4Hp]
        if layer > 0:
            # Input of layers > 0 is the Hp-padded hidden sequence: pad the rows too.
            w_ih_t = jnp.pad(w_ih_t, ((0, Hp - hidden_dim), (0, 0)))  # [Hp, 4Hp]
        w_hh_t = jnp.pad(_pad_gates_cols(w_hh.T, hidden_dim, Hp),
                         ((0, Hp - hidden_dim), (0, 0)))              # [Hp, 4Hp]
        bias = _pad_gates_cols((b_ih + b_hh).reshape(1, 4 * hidden_dim),
                               hidden_dim, Hp)                        # [1, 4Hp] f32

        layers.append({
            "w_ih_t": w_ih_t.astype(jnp.bfloat16),
            "w_hh_t": w_hh_t.astype(jnp.bfloat16),
            "bias": bias,
            "_raw": {"w_ih": w_ih, "w_hh": w_hh, "b_ih": b_ih, "b_hh": b_hh},
        })
    params["lstm"] = layers

    fc_range = 1.0 / math.sqrt(hidden_dim)
    fc_w = jax.random.uniform(k_fc, (vocab_size, hidden_dim), jnp.float32,
                              -fc_range, fc_range)
    # Lane-dense FC: pad rows to Hp and vocab columns to Vp (sliced back afterwards).
    fc_w_t = jnp.pad(fc_w.T, ((0, Hp - hidden_dim), (0, Vp - vocab_size)))  # [Hp, Vp]
    params["fc_w_t"] = fc_w_t.astype(jnp.bfloat16)
    params["fc_b"] = jnp.zeros((1, Vp), jnp.float32)
    params["_raw_fc_w"] = fc_w
    return params


# ------------------------------- model forward ---------------------------------
def lstm_model_forward(params, src, hidden):
    """src: [B, T] int32; hidden: (h0, c0) each [num_layers, B, H]."""
    h0_all, c0_all = hidden
    B, T = src.shape
    H = params["hidden_dim"]
    Hp = params["hidden_dim_padded"]
    V = params["vocab_size"]

    # Embedding lookup + dropout (identity at inference) -- glue, not a kernel.
    embedded = jnp.take(params["embedding"], src, axis=0)   # [B, T, E]
    x = jnp.transpose(embedded, (1, 0, 2))                  # [T, B, in_dim]  time-major
    # TODO(synk): fold this transpose and the output transpose below into the
    # projection / FC BlockSpec index_maps to remove two full HBM round trips.

    h_finals, c_finals = [], []
    for layer, p in enumerate(params["lstm"]):
        in_dim = x.shape[-1]
        # Hoisted input projection for ALL timesteps (bf16 MXU operands, bf16 output).
        xg = matmul_bias(x.reshape(T * B, in_dim), p["w_ih_t"], p["bias"],
                         out_dtype=jnp.bfloat16)
        xg = xg.reshape(T, B, 4 * Hp)

        h0p = jnp.pad(h0_all[layer], ((0, 0), (0, Hp - H)))
        c0p = jnp.pad(c0_all[layer], ((0, 0), (0, Hp - H)))
        x, h_T, c_T = lstm_recurrence(xg, h0p, c0p, p["w_hh_t"])   # x: [T, B, Hp] bf16
        h_finals.append(h_T[:, :H])
        c_finals.append(c_T[:, :H])
        # Inter-layer dropout is identity at inference; no RNG applied.

    output = jnp.transpose(x, (1, 0, 2))                    # [B, T, Hp] (batch_first)
    preds = matmul_bias(output.reshape(B * T, Hp), params["fc_w_t"], params["fc_b"],
                        out_dtype=jnp.float32)              # [B*T, Vp] lane-dense
    predictions = preds.reshape(B, T, -1)[:, :, :V]         # drop vocab lane padding

    h_n = jnp.stack(h_finals, axis=0)                       # [num_layers, B, H]
    c_n = jnp.stack(c_finals, axis=0)
    return predictions, (h_n, c_n)


# ------------------------ pure-JAX reference (check only) ----------------------
def _reference_forward(params, src, hidden):
    h0_all, c0_all = hidden
    H = params["hidden_dim"]
    hi = lax.Precision.HIGHEST

    emb = jnp.take(params["embedding"], src, axis=0)
    x = jnp.transpose(emb, (1, 0, 2))
    h_fin, c_fin = [], []
    for p in params["lstm"]:
        raw = p["_raw"]

        def step(carry, x_t, raw=raw):
            h, c = carry
            g = (jnp.dot(x_t, raw["w_ih"].T, precision=hi)
                 + jnp.dot(h, raw["w_hh"].T, precision=hi)
                 + raw["b_ih"] + raw["b_hh"])
            i = jax.nn.sigmoid(g[:, 0 * H:1 * H])
            f = jax.nn.sigmoid(g[:, 1 * H:2 * H])
            gg = jnp.tanh(g[:, 2 * H:3 * H])
            o = jax.nn.sigmoid(g[:, 3 * H:4 * H])
            c = f * c + i * gg
            h = o * jnp.tanh(c)
            return (h, c), h

        (hT, cT), ys = lax.scan(step, (h0_all[len(h_fin)], c0_all[len(h_fin)]), x)
        x = ys
        h_fin.append(hT)
        c_fin.append(cT)

    out = jnp.transpose(x, (1, 0, 2))
    preds = jnp.dot(out, params["_raw_fc_w"].T, precision=hi)
    return preds, (jnp.stack(h_fin, 0), jnp.stack(c_fin, 0))


# ------------------------------------ main --------------------------------------
if __name__ == "__main__":
    vocab_size = 32
    embedding_dim = 16
    hidden_dim = 32
    num_layers = 2
    dropout_rate = 0.0   # inference: dropout is identity

    batch, seq = 2, 8

    key = jax.random.PRNGKey(0)
    k_params, k_src = jax.random.split(key)
    params = init_params(k_params, vocab_size, embedding_dim, hidden_dim, num_layers)

    src = jax.random.randint(k_src, (batch, seq), 0, vocab_size, dtype=jnp.int32)
    h0 = jnp.zeros((num_layers, batch, hidden_dim), jnp.float32)
    c0 = jnp.zeros((num_layers, batch, hidden_dim), jnp.float32)

    predictions, (h_n, c_n) = lstm_model_forward(params, src, (h0, c0))
    jax.block_until_ready((predictions, h_n, c_n))

    assert predictions.shape == (batch, seq, vocab_size)
    assert h_n.shape == (num_layers, batch, hidden_dim)
    assert c_n.shape == (num_layers, batch, hidden_dim)

    # Numerical sanity check against a pure-JAX f32 reference.  Tolerance accounts
    # for bf16 MXU operands (f32 accumulation / gate math kept throughout).
    ref_preds, (ref_h, ref_c) = _reference_forward(params, src, (h0, c0))
    for got, ref, name in ((predictions, ref_preds, "predictions"),
                           (h_n, ref_h, "h_n"),
                           (c_n, ref_c, "c_n")):
        err = float(jnp.max(jnp.abs(got - ref)))
        assert err < 5e-2, f"{name} mismatch: max abs err {err}"

    print("KERNEL_OK")
</pallas_src>

<mosaic_0001>
module attributes {stable_mosaic.version = 11 : i64} {
  func.func @_matmul_bias_kernel(%arg0: i32, %arg1: i32, %arg2: memref<16x16xf32, #tpu.memory_space<vmem>>, %arg3: memref<16x512xbf16, #tpu.memory_space<vmem>>, %arg4: memref<1x512xf32, #tpu.memory_space<vmem>>, %arg5: memref<16x512xbf16, #tpu.memory_space<vmem>>) attributes {dimension_semantics = [#tpu.dimension_semantics<parallel>, #tpu.dimension_semantics<parallel>], iteration_bounds = array<i64: 1, 1>, scalar_prefetch = 0 : i64, scratch_operands = 0 : i64, tpu.core_type = #tpu.core_type<tc>, window_params = [{transform_indices = @transform_0, window_bounds = array<i64: 16, 16>}, {transform_indices = @transform_1, window_bounds = array<i64: 16, 512>}, {transform_indices = @transform_2, window_bounds = array<i64: 1, 512>}, {transform_indices = @transform_3, window_bounds = array<i64: 16, 512>}]} {
    %c0 = arith.constant 0 : index
    %c0_0 = arith.constant 0 : index
    %0 = vector.load %arg2[%c0, %c0_0] : memref<16x16xf32, #tpu.memory_space<vmem>>, vector<16x16xf32>
    %1 = arith.truncf %0 : vector<16x16xf32> to vector<16x16xbf16>
    %c0_1 = arith.constant 0 : index
    %c0_2 = arith.constant 0 : index
    %2 = vector.load %arg3[%c0_1, %c0_2] : memref<16x512xbf16, #tpu.memory_space<vmem>>, vector<16x512xbf16>
    %cst = arith.constant dense<0.000000e+00> : vector<16x512xf32>
    %3 = tpu.matmul %1, %2, %cst {dimension_numbers = #tpu.dot_dimension_numbers<[1], [0], [0], [1], [0, 0, 1, 1], [], []>} : vector<16x16xbf16>, vector<16x512xbf16>, vector<16x512xf32> -> vector<16x512xf32>
    %c0_3 = arith.constant 0 : index
    %c0_4 = arith.constant 0 : index
    %4 = vector.load %arg4[%c0_3, %c0_4] : memref<1x512xf32, #tpu.memory_space<vmem>>, vector<1x512xf32>
    %5 = vector.broadcast %4 : vector<1x512xf32> to vector<16x512xf32>
    %6 = arith.addf %3, %5 : vector<16x512xf32>
    %7 = arith.truncf %6 : vector<16x512xf32> to vector<16x512xbf16>
    %c0_5 = arith.constant 0 : index
    %c0_6 = arith.constant 0 : index
    %8 = vector.load %arg5[%c0_5, %c0_6] : memref<16x512xbf16, #tpu.memory_space<vmem>>, vector<16x512xbf16>
    tpu.vector_store %arg5[%c0_5, %c0_6], %7 {strides = array<i32>} : memref<16x512xbf16, #tpu.memory_space<vmem>>, vector<16x512xbf16>,
    return
  }
  func.func @transform_0(%arg0: i32, %arg1: i32) -> (i32, i32) {
    %c0_i32 = arith.constant 0 : i32
    %c0_i32_0 = arith.constant 0 : i32
    return %arg0, %c0_i32 : i32, i32
  }
  func.func @transform_1(%arg0: i32, %arg1: i32) -> (i32, i32) {
    %c0_i32 = arith.constant 0 : i32
    %c0_i32_0 = arith.constant 0 : i32
    return %c0_i32, %arg1 : i32, i32
  }
  func.func @transform_2(%arg0: i32, %arg1: i32) -> (i32, i32) {
    %c0_i32 = arith.constant 0 : i32
    %c0_i32_0 = arith.constant 0 : i32
    return %c0_i32, %arg1 : i32, i32
  }
  func.func @transform_3(%arg0: i32, %arg1: i32) -> (i32, i32) {
    %c0_i32 = arith.constant 0 : i32
    return %arg0, %arg1 : i32, i32
  }
}

</mosaic_0001>

<bundles_post_ra>
// kernel: tpu_custom_call.1
= control target key start
LH: loop header
LB: loop body
LE: loop exit
PB: predicated region body
PF: predicated region fallthrough
CT: control target
= control target key end

     0   :  { %8 = vsyncpa [#allocation3], 0  ;;  %s402_s0 = inlined_call_operand.hbm [shape: f32[16,16], index: 0, kind: input, shape index: {}]   ;;  %s403_s1 = inlined_call_operand.hbm [shape: bf16[16,512], index: 1, kind: input, shape index: {}]   ;;  %s404_s2 = inlined_call_operand.vmem [shape: f32[1,512], index: 2, kind: input, shape index: {}]   ;;  %s405_s3 = inlined_call_operand.hbm [shape: bf16[16,512], index: 3, kind: output, shape index: {}]  }
   0x1   :  { %9 = vsyncpa [#allocation6], 0 }
   0x2   :  { %10 = vsyncpa [#allocation4], 0  ;;  %s329_s12 = smov [#allocation2]   ;;  %s257_s16 = scalar_lea.hbm %s402_s0, 256 }
   0x3   :  { %s16_s13 = sshll.u32 %s329_s12, 4  ;;  %p258_p0 = scmp.ne.s32.totalorder %s402_s0, %s257_s16  ;;  %s17_s13 = int_to_ptr.vmem [resolvable:$true] %s16_s13 }
   0x4   :  { %p261_p1 = scmp.lt.u32.totalorder %s257_s16, %s402_s0 }
   0x6   :  { %p263_p2 = pnand %p261_p1, %p258_p0 }
   0x8   :  { %266 = shalt.err (!%p263_p2)
}
   0x9   :  { %s267_s21 = scalar_lea.vmem %s17_s13, 256  ;;  %p272_p4 = scmp.lt.s32.totalorder %s17_s13, %s17_s13 }
   0xa   :  { %p268_p3 = scmp.ne.s32.totalorder %s17_s13, %s267_s21  ;;  %p273_p5 = scmp.lt.s32.totalorder %s267_s21, %s267_s21 }
   0xc   :  { %p274_p6 = por %p273_p5, %p272_p4 }
   0xe   :  { %p275_p7 = pnand %p274_p6, %p268_p3 }
  0x10   :  { %278 = shalt.err (!%p275_p7)
}
  0x11   :  { %s330_s22 = smov 128   ;;  %s331_s23 = smov 8  }
  0x12   :  { %22 = dma.hbm_to_vmem [thread:$0]  %s402_s0, 256, %s17_s13, [#allocation3], %s330_s22, %s330_s22, %s331_s23  }
  0x13   :  { %s332_s26 = smov [#allocation5]   ;;  %s279_s30 = scalar_lea.hbm %s403_s1, 512 }
  0x14   :  { %s28_s27 = sshll.u32 %s332_s26, 4  ;;  %p280_p8 = scmp.ne.s32.totalorder %s403_s1, %s279_s30  ;;  %s29_s27 = int_to_ptr.vmem [resolvable:$true] %s28_s27 }
  0x15   :  { %p283_p9 = scmp.lt.u32.totalorder %s279_s30, %s403_s1 }
  0x17   :  { %p285_p10 = pnand %p283_p9, %p280_p8 }
  0x19   :  { %288 = shalt.err (!%p285_p10)
}
  0x1a   :  { %s289_s8 = scalar_lea.vmem %s29_s27, 512  ;;  %p294_p12 = scmp.lt.s32.totalorder %s29_s27, %s29_s27 }
  0x1b   :  { %p290_p11 = scmp.ne.s32.totalorder %s29_s27, %s289_s8  ;;  %p295_p13 = scmp.lt.s32.totalorder %s289_s8, %s289_s8 }
  0x1d   :  { %p296_p0 = por %p295_p13, %p294_p12 }
  0x1f   :  { %p297_p1 = pnand %p296_p0, %p290_p11 }
  0x21   :  { %300 = shalt.err (!%p297_p1)
}
  0x22   :  { %s333_s0 = smov 256   ;;  %s334_s9 = smov 16  }
  0x23   :  { %34 = dma.hbm_to_vmem [thread:$0]  %s403_s1, 512, %s29_s27, [#allocation6], %s333_s0, %s333_s0, %s334_s9  }
  0x24   :  { %323 = dma.done.wait [#allocation3], 256  }
  0x25   :  { %324 = vsyncadd [#allocation3], 4294967040 }
  0x26   :  { %325 = dma.done.wait [#allocation6], 512  }
  0x27   :  { %326 = vsyncadd [#allocation6], 4294966784  ;;  %v335_v0 = vmov 0   ;;  %v251_v1 = vld [vmem:[#allocation5 + $0x4] ss:$16 sps:$4 sm:$0xff]   ;;  %v45_v6 = vld [vmem:[#allocation2 + $0x8] sm:$0xff]  ;;  %v53_v8 = vlaneseq }
  0x28   :  { %129 = vmatprep.mubr.bf16.mxu0 %v335_v0  ;;  %172 = vmatprep.mubr.bf16.mxu1 %v335_v0  ;;  %v253_v2 = vld [vmem:[#allocation5 + $0xc] ss:$16 sps:$4 sm:$0xff]   ;;  %v255_v3 = vld [vmem:[#allocation5] ss:$16 sps:$4 sm:$0xff]   ;;  %v256_v4 = vld [vmem:[#allocation5 + $0x8] ss:$16 sps:$4 sm:$0xff]  }
  0x29   :  { %97 = vmatprep.subr.bf16.mxu0 %v251_v1  ;;  %v44_v5 = vld [vmem:[#allocation2] sm:$0xff]  ;;  %140 = vmatprep.subr.bf16.mxu1 %v253_v2  ;;  %vm93_vm0 = vcmask 130048   ;;  %v54_v9 = vshrl.u32 %v53_v8, 7 }
  0x2a   :  { %98 = vmatpush1.bf16.msra.mxu0 %v255_v3  ;;  %141 = vmatpush1.bf16.msra.mxu1 %v256_v4  ;;  %v46_v7 = vpack.c.bf16 %v45_v6, %v44_v5  ;;  %v51_v12 = vld [vmem:[%s404_s2] sm:$0xf]  ;;  %s336_s2 = smov [#allocation7]  }
  0x2b   :  { %v55_v10 = vsub.s32 0, %v54_v9  ;;  %v63_v11 = vsub.s32 2, %v54_v9  ;;  %v59_v13 = vsub.s32 1, %v54_v9  ;;  %v67_v14 = vsub.s32 3, %v54_v9  ;;  %s216_s13 = sshll.u32 %s336_s2, 4  ;;  %s217_s13 = int_to_ptr.vmem [resolvable:$true] %s216_s13 }
  0x2c   :  { %s301_s14 = scalar_lea.vmem %s217_s13, 512  ;;  %p306_p3 = scmp.lt.s32.totalorder %s217_s13, %s217_s13 }
  0x2d   :  { %233 = vmatmul.mubr.msk.bf16.vlgmr.msra.gmra.mrb[0].mxu0 %vm93_vm0, %v46_v7  ;;  %234 = vmatmul.mubr.msk.bf16.vlgmr.msra.gmra.mrb[0].mxu1 %vm93_vm0, %v46_v7  ;;  %v56_v15 = vrot.slane %v51_v12, %v55_v10  ;;  %v64_v16 = vrot.slane %v51_v12, %v63_v11  ;;  %v60_v17 = vrot.slane %v51_v12, %v59_v13  ;;  %p302_p2 = scmp.ne.s32.totalorder %s217_s13, %s301_s14  ;;  %p307_p4 = scmp.lt.s32.totalorder %s301_s14, %s301_s14 }
  0x2e   :  { %v68_v18 = vrot.slane %v51_v12, %v67_v14 }
  0x2f   :  { %p308_p5 = por %p307_p4, %p306_p3 }
  0x31   :  { %p309_p6 = pnand %p308_p5, %p302_p2 }
 0x100   :  { %v131_v19 = vpop.f32.mrb[0].mxu0  ;;  %v174_v20 = vpop.f32.mrb[0].mxu1 }
 0x101   :  { %v132_v21 = vadd.f32 %v131_v19, %v56_v15  ;;  %v175_v22 = vadd.f32 %v174_v20, %v64_v16  ;;  %v133_v23 = vpop.f32.mrb[1].mxu0  ;;  %v176_v24 = vpop.f32.mrb[1].mxu1 }
 0x102   :  { %v134_v25 = vadd.f32 %v133_v23, %v60_v17  ;;  %v177_v26 = vadd.f32 %v176_v24, %v68_v18  ;;  %v135_v27 = vpop.f32.mrb[2].mxu0  ;;  %v178_v28 = vpop.f32.mrb[2].mxu1 }
 0x103   :  { %v136_v29 = vadd.f32 %v135_v27, %v56_v15  ;;  %v179_v30 = vadd.f32 %v178_v28, %v64_v16  ;;  %v137_v31 = vpop.f32.mrb[3].mxu0  ;;  %v180_v32 = vpop.f32.mrb[3].mxu1 }
 0x104   :  { %v239_v33 = vpack.c.bf16 %v134_v25, %v132_v21  ;;  %v240_v34 = vpack.c.bf16 %v177_v26, %v175_v22  ;;  %v138_v35 = vadd.f32 %v137_v31, %v60_v17  ;;  %v181_v36 = vadd.f32 %v180_v32, %v68_v18 }
 0x106   :  { %207 = vst [vmem:[#allocation7] sm:$0xff] %v239_v33  ;;  %208 = vst [vmem:[#allocation7 + $0x8] sm:$0xff] %v240_v34  ;;  %v241_v37 = vpack.c.bf16 %v138_v35, %v136_v29  ;;  %v242_v38 = vpack.c.bf16 %v181_v36, %v179_v30 }
 0x108   :  { %209 = vst [vmem:[#allocation7 + $0x10] sm:$0xff] %v241_v37  ;;  %210 = vst [vmem:[#allocation7 + $0x18] sm:$0xff] %v242_v38 }
 0x109   :  { %312 = shalt.err (!%p309_p6)
}
 0x10a   :  { %s313_s17 = scalar_lea.hbm %s405_s3, 512 }
 0x10b   :  { %p314_p7 = scmp.ne.s32.totalorder %s405_s3, %s313_s17  ;;  %p317_p8 = scmp.lt.u32.totalorder %s313_s17, %s405_s3 }
 0x10d   :  { %p319_p9 = pnand %p317_p8, %p314_p7 }
 0x10f   :  { %322 = shalt.err (!%p319_p9)
}
 0x110   :  { %222 = dma.vmem_to_hbm [thread:$0]  %s217_s13, 512, %s405_s3, [#allocation4], %s333_s0, %s333_s0, %s334_s9  }
 0x111   :  { %327 = dma.done.wait [#allocation4], 512  }
 0x112   :  { %328 = vsyncadd [#allocation4], 4294966784 }
 0x113   :  { %226 = vsyncpa [#allocation3], 1 }
 0x114   :  { %227 = vsyncpa [#allocation6], 1 }
 0x115   :  { %228 = vsyncpa [#allocation4], 1 }

</bundles_post_ra>
